<compile_context>
chip_gen: v6e
topology: v6e:2x2x1
jax: 0.10.0
libtpu: 0.0.40
codegen_flags: <defaults>
</compile_context>

<pallas_src>
import functools

import jax
import jax.numpy as jnp
from jax.experimental import pallas as pl
from jax.experimental.pallas import tpu as pltpu


def _round_up(x: int, m: int) -> int:
    return ((x + m - 1) // m) * m


def _vmem_budget_bytes() -> int:
    """~80% of this generation's physical VMEM (headroom for Mosaic scratch)."""
    try:
        cap = int(pltpu.get_tpu_info().vmem_capacity_bytes)
    except Exception:  # query unavailable -> conservative (v7x-sized) fallback
        cap = 64 * 1024 * 1024
    return (cap * 4) // 5


def _resident_spec(shape):
    """Full-array block whose block index never changes across the grid.

    Single-buffer it: double-buffering a constant-index block buys nothing and
    doubles its VMEM footprint (matters on v7x's 64 MiB VMEM at large hidden).
    """
    idx = lambda *_: (0,) * len(shape)
    if hasattr(pl, "Buffered"):
        try:
            return pl.BlockSpec(shape, idx, pipeline_mode=pl.Buffered(1))
        except TypeError:  # jax version without the pipeline_mode kwarg
            pass
    return pl.BlockSpec(shape, idx)


def _mlp_kernel(x_ref, w1_ref, b1_ref, w2_ref, b2_ref, w3_ref, b3_ref, o_ref):
    # x streams in its storage dtype (f32); cast to the bf16 MXU dtype right
    # before the dot (the cast hides under the matmul); accumulate in f32.
    x = x_ref[...].astype(w1_ref.dtype)
    h1 = jnp.dot(x, w1_ref[...], preferred_element_type=jnp.float32)
    h1 = jnp.maximum(h1 + b1_ref[...], 0.0).astype(w2_ref.dtype)
    h2 = jnp.dot(h1, w2_ref[...], preferred_element_type=jnp.float32)
    h2 = jnp.maximum(h2 + b2_ref[...], 0.0).astype(w3_ref.dtype)
    logits = jnp.dot(h2, w3_ref[...], preferred_element_type=jnp.float32)
    o_ref[...] = (logits + b3_ref[...]).astype(o_ref.dtype)


def prepare_params(w1, b1, w2, b2, w3, b3, *, compute_dtype=jnp.bfloat16):
    """One-time parameter prep (call once, keep the result persistent).

    bf16-casts the weights (MXU-native, halves resident weight HBM/VMEM) and
    pads the logits dim to a multiple of 128 so the kernel's output store is
    lane-dense.  Doing this per forward call would add full extra HBM passes
    over the weights, so do NOT call this in the hot path.
    """
    num_classes = w3.shape[1]
    cp = _round_up(num_classes, 128)
    prepared = (
        w1.astype(compute_dtype),                                  # (784, H1)
        b1.astype(jnp.float32).reshape(1, -1),                     # (1, H1)
        w2.astype(compute_dtype),                                  # (H1, H2)
        b2.astype(jnp.float32).reshape(1, -1),                     # (1, H2)
        jnp.pad(w3.astype(compute_dtype), ((0, 0), (0, cp - num_classes))),
        jnp.pad(b3.astype(jnp.float32), (0, cp - num_classes)).reshape(1, cp),
    )
    return prepared, num_classes


@functools.partial(jax.jit, static_argnames=("num_classes", "block_b"))
def mlp_forward(x, w1, b1, w2, b2, w3, b3, *, num_classes, block_b=None):
    """x: (B, C, H, W) NCHW f32; params from prepare_params(). f32 logits."""
    B = x.shape[0]
    x2d = x.reshape(B, -1)                      # torch.flatten(x, start_dim=1)
    d_in = x2d.shape[1]
    H1 = w1.shape[1]
    H2 = w2.shape[1]
    Cp = w3.shape[1]                            # already lane-padded
    assert w1.shape[0] == d_in and w2.shape[0] == H1 and w3.shape[0] == H2
    assert Cp % 128 == 0 and num_classes <= Cp

    x_bytes = x2d.dtype.itemsize
    w_bytes = (w1.size + w2.size + w3.size) * w1.dtype.itemsize
    bias_bytes = (b1.size + b2.size + b3.size) * 4

    # ---- batch tile --------------------------------------------------------
    # Small batches: one tile (splitting a tiny batch across v7x's two TCs only
    # duplicates the resident weights in each core's private VMEM for no
    # compute win).  Large batches: 512-row tiles (multiple of the 256-edge
    # MXU, amortizes the ~0.35us per-grid-step overhead), auto-halved when the
    # generation's VMEM budget would not fit.  Tiles are multiples of 16 (bf16
    # sublane packing).
    if block_b is None:
        block_b = _round_up(max(B, 16), 16) if B <= 512 else 512

    def vmem_est(bb):
        return (2 * bb * d_in * x_bytes          # streamed x (double-buffered)
                + 2 * bb * Cp * 4                # streamed f32 output
                + w_bytes + bias_bytes           # resident weights / biases
                + 2 * bb * max(H1, H2) * 4)      # live f32 activations

    budget = _vmem_budget_bytes()
    while vmem_est(block_b) > budget and block_b > 128:
        block_b //= 2
    block_b = max(16, _round_up(block_b, 16))
    # TODO(synk): if the resident weights alone exceed the VMEM budget
    # (H >~ 4096 on v7x), tile W2's hidden dim with an accumulation grid axis.

    Bp = _round_up(B, block_b)                   # ragged batch -> zero pad
    if Bp != B:
        x2d = jnp.pad(x2d, ((0, Bp - B), (0, 0)))

    grid = (Bp // block_b,)

    # Advisory scheduling hint: actual post-fix traffic (no wrapper copies).
    flops = 2 * Bp * (d_in * H1 + H1 * H2 + H2 * Cp)
    bytes_accessed = Bp * d_in * x_bytes + w_bytes + bias_bytes + Bp * Cp * 4
    vmem_limit = int(min(budget,
                         max(vmem_est(block_b) * 3 // 2, 32 * 1024 * 1024)))

    out_pad = pl.pallas_call(
        _mlp_kernel,
        out_shape=jax.ShapeDtypeStruct((Bp, Cp), jnp.float32),
        grid_spec=pltpu.PrefetchScalarGridSpec(
            num_scalar_prefetch=0,
            grid=grid,
            in_specs=[
                pl.BlockSpec((block_b, d_in), lambda i: (i, 0)),  # x tile
                _resident_spec((d_in, H1)),                       # W1 (in,out)
                _resident_spec((1, H1)),                          # b1
                _resident_spec((H1, H2)),                         # W2
                _resident_spec((1, H2)),                          # b2
                _resident_spec((H2, Cp)),                         # W3 (padded)
                _resident_spec((1, Cp)),                          # b3 (padded)
            ],
            out_specs=pl.BlockSpec((block_b, Cp), lambda i: (i, 0)),
        ),
        compiler_params=pltpu.CompilerParams(
            dimension_semantics=("parallel",),
            vmem_limit_bytes=vmem_limit,
        ),
        cost_estimate=pl.CostEstimate(
            flops=flops, transcendentals=0, bytes_accessed=bytes_accessed),
    )(x2d, w1, b1, w2, b2, w3, b3)

    return out_pad[:B, :num_classes]


def init_params(key, d_in=784, hidden=1024, num_classes=10):
    """PyTorch-Linear-style uniform init; weights stored transposed (in, out)."""
    ks = jax.random.split(key, 6)

    def linear(kw, kb, fan_in, fan_out):
        bound = 1.0 / jnp.sqrt(fan_in)
        w = jax.random.uniform(kw, (fan_in, fan_out), jnp.float32, -bound, bound)
        b = jax.random.uniform(kb, (fan_out,), jnp.float32, -bound, bound)
        return w, b

    w1, b1 = linear(ks[0], ks[1], d_in, hidden)
    w2, b2 = linear(ks[2], ks[3], hidden, hidden)
    w3, b3 = linear(ks[4], ks[5], hidden, num_classes)
    return w1, b1, w2, b2, w3, b3


def _reference(x, w1, b1, w2, b2, w3, b3):
    """Pure-JAX reference with identical bf16 storage / f32 accumulation."""
    xb = x.reshape(x.shape[0], -1).astype(jnp.bfloat16)
    w1b, w2b, w3b = (w.astype(jnp.bfloat16) for w in (w1, w2, w3))
    h = jnp.maximum(jnp.dot(xb, w1b, preferred_element_type=jnp.float32) + b1, 0.0)
    h = jnp.maximum(jnp.dot(h.astype(jnp.bfloat16), w2b,
                            preferred_element_type=jnp.float32) + b2, 0.0)
    return jnp.dot(h.astype(jnp.bfloat16), w3b,
                   preferred_element_type=jnp.float32) + b3


if __name__ == "__main__":
    key = jax.random.PRNGKey(0)
    k_x, k_p = jax.random.split(key)

    # Small shapes: MNIST-like inputs, hidden=128, 10 classes.
    batch, hidden, num_classes = 16, 128, 10
    x = jax.random.normal(k_x, (batch, 1, 28, 28), jnp.float32)
    raw = init_params(k_p, 784, hidden, num_classes)

    # One-time param prep (persistent bf16/padded copies), outside the hot path.
    params, C = prepare_params(*raw)
    params = jax.block_until_ready(params)

    logits = mlp_forward(x, *params, num_classes=C)
    logits = jax.block_until_ready(logits)
    assert logits.shape == (batch, num_classes)
    assert logits.dtype == jnp.float32

    ref = _reference(x, *raw)
    max_err = float(jnp.max(jnp.abs(logits - ref)))
    assert jnp.allclose(logits, ref, atol=2e-2, rtol=2e-2), max_err

    # Ragged batch + multi-step grid path (explicit small tile).
    x2 = jax.random.normal(k_x, (40, 1, 28, 28), jnp.float32)
    logits2 = jax.block_until_ready(
        mlp_forward(x2, *params, num_classes=C, block_b=16))
    ref2 = _reference(x2, *raw)
    assert logits2.shape == (40, num_classes)
    assert jnp.allclose(logits2, ref2, atol=2e-2, rtol=2e-2)

    print("KERNEL_OK")
</pallas_src>

<mosaic_0001>
module attributes {stable_mosaic.version = 11 : i64} {
  func.func @_mlp_kernel(%arg0: i32, %arg1: memref<16x784xf32, #tpu.memory_space<vmem>>, %arg2: memref<784x128xbf16, #tpu.memory_space<vmem>>, %arg3: memref<1x128xf32, #tpu.memory_space<vmem>>, %arg4: memref<128x128xbf16, #tpu.memory_space<vmem>>, %arg5: memref<1x128xf32, #tpu.memory_space<vmem>>, %arg6: memref<128x128xbf16, #tpu.memory_space<vmem>>, %arg7: memref<1x128xf32, #tpu.memory_space<vmem>>, %arg8: memref<16x128xf32, #tpu.memory_space<vmem>>) attributes {dimension_semantics = [#tpu.dimension_semantics<parallel>], iteration_bounds = array<i64: 1>, scalar_prefetch = 0 : i64, scratch_operands = 0 : i64, tpu.core_type = #tpu.core_type<tc>, window_params = [{transform_indices = @transform_0, window_bounds = array<i64: 16, 784>}, {pipeline_mode = #tpu.pipeline_mode<synchronous>, transform_indices = @transform_1, window_bounds = array<i64: 784, 128>}, {pipeline_mode = #tpu.pipeline_mode<synchronous>, transform_indices = @transform_2, window_bounds = array<i64: 1, 128>}, {pipeline_mode = #tpu.pipeline_mode<synchronous>, transform_indices = @transform_3, window_bounds = array<i64: 128, 128>}, {pipeline_mode = #tpu.pipeline_mode<synchronous>, transform_indices = @transform_4, window_bounds = array<i64: 1, 128>}, {pipeline_mode = #tpu.pipeline_mode<synchronous>, transform_indices = @transform_5, window_bounds = array<i64: 128, 128>}, {pipeline_mode = #tpu.pipeline_mode<synchronous>, transform_indices = @transform_6, window_bounds = array<i64: 1, 128>}, {transform_indices = @transform_7, window_bounds = array<i64: 16, 128>}]} {
    %c0 = arith.constant 0 : index
    %c0_0 = arith.constant 0 : index
    %0 = vector.load %arg1[%c0, %c0_0] : memref<16x784xf32, #tpu.memory_space<vmem>>, vector<16x784xf32>
    %1 = arith.truncf %0 : vector<16x784xf32> to vector<16x784xbf16>
    %c0_1 = arith.constant 0 : index
    %c0_2 = arith.constant 0 : index
    %2 = vector.load %arg2[%c0_1, %c0_2] : memref<784x128xbf16, #tpu.memory_space<vmem>>, vector<784x128xbf16>
    %cst = arith.constant dense<0.000000e+00> : vector<16x128xf32>
    %3 = tpu.matmul %1, %2, %cst {dimension_numbers = #tpu.dot_dimension_numbers<[1], [0], [0], [1], [0, 0, 1, 1], [], []>} : vector<16x784xbf16>, vector<784x128xbf16>, vector<16x128xf32> -> vector<16x128xf32>
    %c0_3 = arith.constant 0 : index
    %c0_4 = arith.constant 0 : index
    %4 = vector.load %arg3[%c0_3, %c0_4] : memref<1x128xf32, #tpu.memory_space<vmem>>, vector<1x128xf32>
    %5 = vector.broadcast %4 : vector<1x128xf32> to vector<16x128xf32>
    %6 = arith.addf %3, %5 : vector<16x128xf32>
    %cst_5 = arith.constant 0.000000e+00 : f32
    %7 = vector.broadcast %cst_5 : f32 to vector<16x128xf32>
    %8 = arith.maximumf %6, %7 : vector<16x128xf32>
    %9 = arith.truncf %8 : vector<16x128xf32> to vector<16x128xbf16>
    %c0_6 = arith.constant 0 : index
    %c0_7 = arith.constant 0 : index
    %10 = vector.load %arg4[%c0_6, %c0_7] : memref<128x128xbf16, #tpu.memory_space<vmem>>, vector<128x128xbf16>
    %cst_8 = arith.constant dense<0.000000e+00> : vector<16x128xf32>
    %11 = tpu.matmul %9, %10, %cst_8 {dimension_numbers = #tpu.dot_dimension_numbers<[1], [0], [0], [1], [0, 0, 1, 1], [], []>} : vector<16x128xbf16>, vector<128x128xbf16>, vector<16x128xf32> -> vector<16x128xf32>
    %c0_9 = arith.constant 0 : index
    %c0_10 = arith.constant 0 : index
    %12 = vector.load %arg5[%c0_9, %c0_10] : memref<1x128xf32, #tpu.memory_space<vmem>>, vector<1x128xf32>
    %13 = vector.broadcast %12 : vector<1x128xf32> to vector<16x128xf32>
    %14 = arith.addf %11, %13 : vector<16x128xf32>
    %cst_11 = arith.constant 0.000000e+00 : f32
    %15 = vector.broadcast %cst_11 : f32 to vector<16x128xf32>
    %16 = arith.maximumf %14, %15 : vector<16x128xf32>
    %17 = arith.truncf %16 : vector<16x128xf32> to vector<16x128xbf16>
    %c0_12 = arith.constant 0 : index
    %c0_13 = arith.constant 0 : index
    %18 = vector.load %arg6[%c0_12, %c0_13] : memref<128x128xbf16, #tpu.memory_space<vmem>>, vector<128x128xbf16>
    %cst_14 = arith.constant dense<0.000000e+00> : vector<16x128xf32>
    %19 = tpu.matmul %17, %18, %cst_14 {dimension_numbers = #tpu.dot_dimension_numbers<[1], [0], [0], [1], [0, 0, 1, 1], [], []>} : vector<16x128xbf16>, vector<128x128xbf16>, vector<16x128xf32> -> vector<16x128xf32>
    %c0_15 = arith.constant 0 : index
    %c0_16 = arith.constant 0 : index
    %20 = vector.load %arg7[%c0_15, %c0_16] : memref<1x128xf32, #tpu.memory_space<vmem>>, vector<1x128xf32>
    %21 = vector.broadcast %20 : vector<1x128xf32> to vector<16x128xf32>
    %22 = arith.addf %19, %21 : vector<16x128xf32>
    %c0_17 = arith.constant 0 : index
    %c0_18 = arith.constant 0 : index
    %23 = vector.load %arg8[%c0_17, %c0_18] : memref<16x128xf32, #tpu.memory_space<vmem>>, vector<16x128xf32>
    tpu.vector_store %arg8[%c0_17, %c0_18], %22 {strides = array<i32>} : memref<16x128xf32, #tpu.memory_space<vmem>>, vector<16x128xf32>,
    return
  }
  func.func @transform_0(%arg0: i32) -> (i32, i32) {
    %c0_i32 = arith.constant 0 : i32
    %c0_i32_0 = arith.constant 0 : i32
    return %arg0, %c0_i32 : i32, i32
  }
  func.func @transform_1(%arg0: i32) -> (i32, i32) {
    %c0_i32 = arith.constant 0 : i32
    %c0_i32_0 = arith.constant 0 : i32
    %c0_i32_1 = arith.constant 0 : i32
    return %c0_i32, %c0_i32_0 : i32, i32
  }
  func.func @transform_2(%arg0: i32) -> (i32, i32) {
    %c0_i32 = arith.constant 0 : i32
    %c0_i32_0 = arith.constant 0 : i32
    %c0_i32_1 = arith.constant 0 : i32
    return %c0_i32, %c0_i32_0 : i32, i32
  }
  func.func @transform_3(%arg0: i32) -> (i32, i32) {
    %c0_i32 = arith.constant 0 : i32
    %c0_i32_0 = arith.constant 0 : i32
    %c0_i32_1 = arith.constant 0 : i32
    return %c0_i32, %c0_i32_0 : i32, i32
  }
  func.func @transform_4(%arg0: i32) -> (i32, i32) {
    %c0_i32 = arith.constant 0 : i32
    %c0_i32_0 = arith.constant 0 : i32
    %c0_i32_1 = arith.constant 0 : i32
    return %c0_i32, %c0_i32_0 : i32, i32
  }
  func.func @transform_5(%arg0: i32) -> (i32, i32) {
    %c0_i32 = arith.constant 0 : i32
    %c0_i32_0 = arith.constant 0 : i32
    %c0_i32_1 = arith.constant 0 : i32
    return %c0_i32, %c0_i32_0 : i32, i32
  }
  func.func @transform_6(%arg0: i32) -> (i32, i32) {
    %c0_i32 = arith.constant 0 : i32
    %c0_i32_0 = arith.constant 0 : i32
    %c0_i32_1 = arith.constant 0 : i32
    return %c0_i32, %c0_i32_0 : i32, i32
  }
  func.func @transform_7(%arg0: i32) -> (i32, i32) {
    %c0_i32 = arith.constant 0 : i32
    %c0_i32_0 = arith.constant 0 : i32
    return %arg0, %c0_i32 : i32, i32
  }
}

</mosaic_0001>

<bundles_post_ra>
// kernel: mlp_forward.1
= control target key start
LH: loop header
LB: loop body
LE: loop exit
PB: predicated region body
PF: predicated region fallthrough
CT: control target
= control target key end

     0   :  { %v1157_v43 = vmov 0.0   ;;  %vm1158_vm0 = vmmov 0   ;;  %vm448_vm1 = vcmask 130048   ;;  %s1474_s0 = inlined_call_operand.vmem [shape: f32[16,784], index: 0, kind: input, shape index: {}]   ;;  %s1475_s1 = inlined_call_operand.vmem [shape: bf16[784,128], index: 1, kind: input, shape index: {}]   ;;  %s1476_s2 = inlined_call_operand.vmem [shape: f32[1,128], index: 2, kind: input, shape index: {}]   ;;  %s1477_s3 = inlined_call_operand.vmem [shape: bf16[128,128], index: 3, kind: input, shape index: {}]   ;;  %s1478_s4 = inlined_call_operand.vmem [shape: f32[1,128], index: 4, kind: input, shape index: {}]   ;;  %s1479_s5 = inlined_call_operand.vmem [shape: bf16[128,128], index: 5, kind: input, shape index: {}]   ;;  %s1480_s6 = inlined_call_operand.vmem [shape: f32[1,128], index: 6, kind: input, shape index: {}]   ;;  %s1481_s7 = inlined_call_operand.hbm [shape: f32[16,128], index: 7, kind: output, shape index: {}]  }
   0x1   :  { %v1070_v0 = vld [vmem:[%s1475_s1 + $0x78] sm:$0xff]   ;;  %v1074_v4 = vld [vmem:[%s1475_s1 + $0x70] sm:$0xff]   ;;  %v1078_v8 = vld [vmem:[%s1475_s1 + $0x68] sm:$0xff]  }
   0x2   :  { %v1071_v1 = vld [vmem:[%s1475_s1 + $0x38] sm:$0xff]   ;;  %933 = vmatprep.subr.bf16.mxu0 %v1070_v0  ;;  %v1075_v5 = vld [vmem:[%s1475_s1 + $0x30] sm:$0xff]   ;;  %v1079_v9 = vld [vmem:[%s1475_s1 + $0x28] sm:$0xff]  }
   0x3   :  { %v1072_v2 = vld [vmem:[%s1475_s1 + $0xf8] sm:$0xff]   ;;  %934 = vmatpush3.bf16.msra.mxu0 %v1071_v1  ;;  %v1076_v6 = vld [vmem:[%s1475_s1 + $0xf0] sm:$0xff]   ;;  %v1080_v10 = vld [vmem:[%s1475_s1 + $0xe8] sm:$0xff]  }
   0x4   :  { %v1073_v3 = vld [vmem:[%s1475_s1 + $0xb8] sm:$0xff]   ;;  %955 = vmatprep.subr.bf16.mxu1 %v1072_v2  ;;  %935 = vmatprep.subr.bf16.mxu0 %v1074_v4  ;;  %v1077_v7 = vld [vmem:[%s1475_s1 + $0xb0] sm:$0xff]   ;;  %v1081_v11 = vld [vmem:[%s1475_s1 + $0xa8] sm:$0xff]  }
   0x5   :  { %956 = vmatpush3.bf16.msra.mxu1 %v1073_v3  ;;  %v1082_v12 = vld [vmem:[%s1475_s1 + $0x60] sm:$0xff]   ;;  %v1086_v16 = vld [vmem:[%s1475_s1 + $0x58] sm:$0xff]   ;;  %v1090_v20 = vld [vmem:[%s1475_s1 + $0x50] sm:$0xff]  }
   0x6   :  { %957 = vmatprep.subr.bf16.mxu1 %v1076_v6  ;;  %v1083_v13 = vld [vmem:[%s1475_s1 + $0x20] sm:$0xff]   ;;  %v1087_v17 = vld [vmem:[%s1475_s1 + $0x18] sm:$0xff]   ;;  %v1091_v21 = vld [vmem:[%s1475_s1 + $0x10] sm:$0xff]  }
   0x7   :  { %936 = vmatpush3.bf16.msra.mxu0 %v1075_v5  ;;  %v1084_v14 = vld [vmem:[%s1475_s1 + $0xe0] sm:$0xff]   ;;  %v1088_v18 = vld [vmem:[%s1475_s1 + $0xd8] sm:$0xff]   ;;  %v1092_v22 = vld [vmem:[%s1475_s1 + $0xd0] sm:$0xff]  }
   0x8   :  { %937 = vmatprep.subr.bf16.mxu0 %v1078_v8  ;;  %v1085_v15 = vld [vmem:[%s1475_s1 + $0xa0] sm:$0xff]   ;;  %v1089_v19 = vld [vmem:[%s1475_s1 + $0x98] sm:$0xff]   ;;  %v1093_v23 = vld [vmem:[%s1475_s1 + $0x90] sm:$0xff]  }
   0x9   :  { %958 = vmatpush3.bf16.msra.mxu1 %v1077_v7  ;;  %v1094_v24 = vld [vmem:[%s1475_s1 + $0x48] sm:$0xff]   ;;  %v1098_v28 = vld [vmem:[%s1475_s1 + $0x40] sm:$0xff]   ;;  %v35_v36 = vld [vmem:[%s1474_s0 + $0x38] sm:$0xff] }
   0xa   :  { %959 = vmatprep.subr.bf16.mxu1 %v1080_v10  ;;  %v1095_v25 = vld [vmem:[%s1475_s1 + $0x8] sm:$0xff]   ;;  %v1099_v29 = vld [vmem:[%s1475_s1] sm:$0xff]   ;;  %v1102_v38 = vld [vmem:[%s1475_s1 + $0x178] sm:$0xff]  }
   0xb   :  { %938 = vmatpush3.bf16.msra.mxu0 %v1079_v9  ;;  %v1096_v26 = vld [vmem:[%s1475_s1 + $0xc8] sm:$0xff]   ;;  %v1100_v30 = vld [vmem:[%s1475_s1 + $0xc0] sm:$0xff]   ;;  %v31_v39 = vld [vmem:[%s1474_s0 + $0x18] sm:$0xff] }
   0xc   :  { %939 = vmatprep.subr.bf16.mxu0 %v1082_v12  ;;  %v1097_v27 = vld [vmem:[%s1475_s1 + $0x88] sm:$0xff]   ;;  %v36_v32 = vld [vmem:[%s1474_s0 + $0x40] sm:$0xff]  ;;  %v38_v40 = vld [vmem:[%s1474_s0 + $0x50] sm:$0xff] }
   0xd   :  { %960 = vmatpush3.bf16.msra.mxu1 %v1081_v11  ;;  %v29_v31 = vld [vmem:[%s1474_s0 + $0x8] sm:$0xff]  ;;  %v1101_v34 = vld [vmem:[%s1475_s1 + $0x80] sm:$0xff]   ;;  %v45_v41 = vpack.c.bf16 %v38_v40, %v31_v39  ;;  %v1103_v42 = vld [vmem:[%s1475_s1 + $0x138] sm:$0xff]  }
   0xe   :  { %961 = vmatprep.subr.bf16.mxu1 %v1084_v14  ;;  %v43_v33 = vpack.c.bf16 %v36_v32, %v29_v31  ;;  %v28_v35 = vld [vmem:[%s1474_s0] sm:$0xff]  ;;  %v30_v44 = vld [vmem:[%s1474_s0 + $0x10] sm:$0xff]  ;;  %v37_v45 = vld [vmem:[%s1474_s0 + $0x48] sm:$0xff] }
   0xf   :  { %940 = vmatpush3.bf16.msra.mxu0 %v1083_v13  ;;  %v42_v37 = vpack.c.bf16 %v35_v36, %v28_v35  ;;  %525 = vmatprep.mubr.bf16.mxu1 %v45_v41  ;;  %v44_v46 = vpack.c.bf16 %v37_v45, %v30_v44  ;;  %v1104_v47 = vld [vmem:[%s1475_s1 + $0x170] sm:$0xff]   ;;  %v1106_v49 = vld [vmem:[%s1475_s1 + $0x168] sm:$0xff]   ;;  %v1108_v51 = vld [vmem:[%s1475_s1 + $0x160] sm:$0xff]  }
  0x10   :  { %941 = vmatprep.subr.bf16.mxu0 %v1086_v16  ;;  %484 = vmatprep.mubr.bf16.mxu0 %v43_v33  ;;  %v1105_v48 = vld [vmem:[%s1475_s1 + $0x130] sm:$0xff]   ;;  %v1107_v50 = vld [vmem:[%s1475_s1 + $0x128] sm:$0xff]   ;;  %v1109_v52 = vld [vmem:[%s1475_s1 + $0x120] sm:$0xff]  }
  0x11   :  { %962 = vmatpush3.bf16.msra.mxu1 %v1085_v15  ;;  %v1110_v53 = vld [vmem:[%s1475_s1 + $0x158] sm:$0xff]   ;;  %v1112_v55 = vld [vmem:[%s1475_s1 + $0x150] sm:$0xff]   ;;  %v1118_v56 = vld [vmem:[%s1475_s1 + $0x180] sm:$0xff]  }
  0x12   :  { %963 = vmatprep.subr.bf16.mxu1 %v1088_v18  ;;  %v1111_v54 = vld [vmem:[%s1475_s1 + $0x118] sm:$0xff]   ;;  %v33_v57 = vld [vmem:[%s1474_s0 + $0x28] sm:$0xff]  ;;  %v1113_v58 = vld [vmem:[%s1475_s1 + $0x110] sm:$0xff]  }
  0x13   :  { %942 = vmatpush3.bf16.msra.mxu0 %v1087_v17  ;;  %v1114_v59 = vld [vmem:[%s1475_s1 + $0x148] sm:$0xff]   ;;  %v40_v60 = vld [vmem:[%s1474_s0 + $0x60] sm:$0xff]  ;;  %v34_v62 = vld [vmem:[%s1474_s0 + $0x30] sm:$0xff] }
  0x14   :  { %943 = vmatprep.subr.bf16.mxu0 %v1090_v20  ;;  %v47_v61 = vpack.c.bf16 %v40_v60, %v33_v57  ;;  %v41_v63 = vld [vmem:[%s1474_s0 + $0x68] sm:$0xff]  ;;  %v1116_v2 = vld [vmem:[%s1475_s1 + $0x140] sm:$0xff]   ;;  %v39_v5 = vld [vmem:[%s1474_s0 + $0x58] sm:$0xff] }
  0x15   :  { %964 = vmatpush3.bf16.msra.mxu1 %v1089_v19  ;;  %v48_v0 = vpack.c.bf16 %v41_v63, %v34_v62  ;;  %v1115_v1 = vld [vmem:[%s1475_s1 + $0x108] sm:$0xff]   ;;  %v1117_v3 = vld [vmem:[%s1475_s1 + $0x100] sm:$0xff]  }
  0x16   :  { %965 = vmatprep.subr.bf16.mxu1 %v1092_v22  ;;  %v32_v4 = vld [vmem:[%s1474_s0 + $0x20] sm:$0xff] }
  0x17   :  { %944 = vmatpush3.bf16.msra.mxu0 %v1091_v21  ;;  %v46_v6 = vpack.c.bf16 %v39_v5, %v32_v4 }
  0x18   :  { %945 = vmatprep.subr.bf16.mxu0 %v1094_v24 }
  0x19   :  { %966 = vmatpush3.bf16.msra.mxu1 %v1093_v23 }
  0x1a   :  { %967 = vmatprep.subr.bf16.mxu1 %v1096_v26 }
  0x1b   :  { %946 = vmatpush3.bf16.msra.mxu0 %v1095_v25 }
  0x1c   :  { %947 = vmatprep.subr.bf16.mxu0 %v1098_v28 }
  0x1d   :  { %968 = vmatpush3.bf16.msra.mxu1 %v1097_v27 }
  0x1e   :  { %969 = vmatprep.subr.bf16.mxu1 %v1100_v30 }
  0x1f   :  { %948 = vmatpush3.bf16.msra.mxu0 %v1099_v29 }
  0x20   :  { %977 = vmatprep.subr.bf16.mxu0 %v1102_v38 }
  0x21   :  { %970 = vmatpush3.bf16.msra.mxu1 %v1101_v34 }
  0x22   :  { %1019 = vmatprep.subr.bf16.mxu1 %v1157_v43  ;;  %485 = vmatmul.mubr.bf16.vlgmr.msra.gmra.mxu0 %v42_v37 }
  0x23   :  { %978 = vmatpush3.bf16.msra.mxu0 %v1103_v42  ;;  %566 = vmatprep.mubr.bf16.mxu0 %v47_v61 }
  0x24   :  { %526 = vmatmul.mubr.bf16.vlgmr.msra.gmra.mxu1 %v44_v46  ;;  %979 = vmatprep.subr.bf16.mxu0 %v1104_v47 }
  0x25   :  { %1021 = vmatprep.mubr.msk.bf16.mxu1 %vm1158_vm0, %v1157_v43  ;;  %1020 = vmatpush3.bf16.msra.mxu1 %v1118_v56 }
  0x26   :  { %1025 = vmatprep.subr.bf16.mxu1 %v1157_v43 }
  0x27   :  { %980 = vmatpush3.bf16.msra.mxu0 %v1105_v48 }
  0x28   :  { %981 = vmatprep.subr.bf16.mxu0 %v1106_v49 }
  0x2b   :  { %982 = vmatpush3.bf16.msra.mxu0 %v1107_v50 }
  0x2c   :  { %983 = vmatprep.subr.bf16.mxu0 %v1108_v51  ;;  %1022 = vmatmul.mubr.msk.bf16.vlgmr.msra.gmra.mxu1 %vm448_vm1, %v48_v0 }
  0x2d   :  { %1041 = vmatprep.mubr.msk.bf16.mxu1 %vm1158_vm0, %v1157_v43 }
  0x2f   :  { %984 = vmatpush3.bf16.msra.mxu0 %v1109_v52 }
  0x30   :  { %985 = vmatprep.subr.bf16.mxu0 %v1110_v53 }
  0x33   :  { %986 = vmatpush3.bf16.msra.mxu0 %v1111_v54 }
  0x34   :  { %987 = vmatprep.subr.bf16.mxu0 %v1112_v55 }
  0x37   :  { %988 = vmatpush3.bf16.msra.mxu0 %v1113_v58 }
  0x38   :  { %989 = vmatprep.subr.bf16.mxu0 %v1114_v59 }
  0x3b   :  { %990 = vmatpush3.bf16.msra.mxu0 %v1115_v1 }
  0x3c   :  { %991 = vmatprep.subr.bf16.mxu0 %v1116_v2 }
  0x3d   :  { %12 = vsyncpa [#allocation3], 0  ;;  %v1119_v7 = vld [vmem:[%s1477_s3 + $0x38] sm:$0xff]   ;;  %v1120_v8 = vld [vmem:[%s1477_s3 + $0x30] sm:$0xff]  }
  0x3e   :  { %1026 = vmatpush3.bf16.msra.mxu1 %v1119_v7  ;;  %v1121_v9 = vld [vmem:[%s1477_s3 + $0x28] sm:$0xff]   ;;  %v1122_v10 = vld [vmem:[%s1477_s3 + $0x20] sm:$0xff]   ;;  %v1123_v11 = vld [vmem:[%s1477_s3 + $0x18] sm:$0xff]  }
  0x3f   :  { %992 = vmatpush3.bf16.msra.mxu0 %v1117_v3  ;;  %1027 = vmatprep.subr.bf16.mxu1 %v1157_v43  ;;  %v1124_v12 = vld [vmem:[%s1477_s3 + $0x10] sm:$0xff]   ;;  %v1125_v13 = vld [vmem:[%s1477_s3 + $0x8] sm:$0xff]   ;;  %v1126_v14 = vld [vmem:[%s1477_s3] sm:$0xff]  }
  0x40   :  { %1045 = vmatprep.subr.bf16.mxu0 %v1157_v43  ;;  %v1127_v15 = vld [vmem:[%s1479_s5 + $0x38] sm:$0xff]   ;;  %v1128_v16 = vld [vmem:[%s1479_s5 + $0x30] sm:$0xff]   ;;  %v1129_v17 = vld [vmem:[%s1479_s5 + $0x28] sm:$0xff]  }
  0x41   :  { %v1130_v18 = vld [vmem:[%s1479_s5 + $0x20] sm:$0xff]   ;;  %v1131_v19 = vld [vmem:[%s1479_s5 + $0x18] sm:$0xff]   ;;  %v1132_v55 = vld [vmem:[%s1479_s5 + $0x10] sm:$0xff]  }
  0x42   :  { %567 = vmatmul.mubr.bf16.vlgmr.msra.gmra.mxu0 %v46_v6  ;;  %1028 = vmatpush3.bf16.msra.mxu1 %v1120_v8  ;;  %v864_v32 = vld [vmem:[%s1476_s2] ss:$0 sm:$0xff]  ;;  %v1133_v56 = vld [vmem:[%s1479_s5 + $0x8] sm:$0xff]  }
  0x43   :  { %1061 = vmatprep.mubr.msk.bf16.mxu0 %vm1158_vm0, %v1157_v43  ;;  %1029 = vmatprep.subr.bf16.mxu1 %v1157_v43  ;;  %v1134_v57 = vld [vmem:[%s1479_s5] sm:$0xff]   ;;  %s1159_s5 = smov [#allocation2]  }
  0x44   :  { %1046 = vmatpush3.bf16.msra.mxu0 %v1127_v15  ;;  %v915_v58 = vld [vmem:[%s1478_s4] ss:$0 sm:$0xff]  ;;  %s853_s21 = sshll.u32 %s1159_s5, 4  ;;  %s854_s21 = int_to_ptr.vmem [resolvable:$true] %s853_s21 }
  0x45   :  { %1047 = vmatprep.subr.bf16.mxu0 %v1157_v43  ;;  %s1135_s4 = scalar_lea.vmem %s854_s21, 256  ;;  %p1140_p1 = scmp.lt.s32.totalorder %s854_s21, %s854_s21 }
  0x46   :  { %1030 = vmatpush3.bf16.msra.mxu1 %v1121_v9  ;;  %p1136_p0 = scmp.ne.s32.totalorder %s854_s21, %s1135_s4  ;;  %p1141_p2 = scmp.lt.s32.totalorder %s1135_s4, %s1135_s4 }
  0x47   :  { %1031 = vmatprep.subr.bf16.mxu1 %v1157_v43 }
  0x48   :  { %1048 = vmatpush3.bf16.msra.mxu0 %v1128_v16  ;;  %p1142_p3 = por %p1141_p2, %p1140_p1 }
  0x49   :  { %1049 = vmatprep.subr.bf16.mxu0 %v1157_v43 }
  0x4a   :  { %1032 = vmatpush3.bf16.msra.mxu1 %v1122_v10  ;;  %p1143_p4 = pnand %p1142_p3, %p1136_p0 }
  0x4b   :  { %1033 = vmatprep.subr.bf16.mxu1 %v1157_v43 }
  0x4c   :  { %1050 = vmatpush3.bf16.msra.mxu0 %v1129_v17 }
  0x4d   :  { %1051 = vmatprep.subr.bf16.mxu0 %v1157_v43 }
  0x4e   :  { %1034 = vmatpush3.bf16.msra.mxu1 %v1123_v11 }
  0x4f   :  { %1035 = vmatprep.subr.bf16.mxu1 %v1157_v43 }
  0x50   :  { %1052 = vmatpush3.bf16.msra.mxu0 %v1130_v18 }
  0x51   :  { %1053 = vmatprep.subr.bf16.mxu0 %v1157_v43 }
  0x52   :  { %1036 = vmatpush3.bf16.msra.mxu1 %v1124_v12 }
  0x53   :  { %1037 = vmatprep.subr.bf16.mxu1 %v1157_v43 }
  0x54   :  { %1054 = vmatpush3.bf16.msra.mxu0 %v1131_v19 }
  0x55   :  { %1055 = vmatprep.subr.bf16.mxu0 %v1157_v43 }
  0x56   :  { %1038 = vmatpush3.bf16.msra.mxu1 %v1125_v13 }
  0x57   :  { %1039 = vmatprep.subr.bf16.mxu1 %v1157_v43 }
  0x58   :  { %1056 = vmatpush3.bf16.msra.mxu0 %v1132_v55 }
  0x59   :  { %1057 = vmatprep.subr.bf16.mxu0 %v1157_v43 }
  0x5a   :  { %1040 = vmatpush3.bf16.msra.mxu1 %v1126_v14 }
  0x5c   :  { %1058 = vmatpush3.bf16.msra.mxu0 %v1133_v56 }
  0x5d   :  { %1059 = vmatprep.subr.bf16.mxu0 %v1157_v43  ;;  %v924_v43 = vld [vmem:[%s1480_s6] ss:$0 sm:$0xff] }
  0x60   :  { %1060 = vmatpush3.bf16.msra.mxu0 %v1134_v57 }
  0xe2   :  { %v949_v23 = vpop.f32.mrf.mxu0 }
  0xe4   :  { %v971_v20 = vpop.f32.mrf.mxu1  ;;  %v950_v25 = vpop.f32.mrf.mxu0 }
  0xe5   :  { %v951_v31 = vadd.f32 %v950_v25, %v949_v23 }
  0xe6   :  { %v972_v21 = vpop.f32.mrf.mxu1  ;;  %v952_v28 = vpop.f32.mrf.mxu0 }
  0xe7   :  { %v487_v34 = vadd.f32 %v951_v31, %v864_v32  ;;  %v973_v35 = vadd.f32 %v972_v21, %v971_v20 }
  0xe8   :  { %v974_v22 = vpop.f32.mrf.mxu1  ;;  %v953_v33 = vpop.f32.mrf.mxu0 }
  0xe9   :  { %v954_v36 = vadd.f32 %v953_v33, %v952_v28  ;;  %v528_v39 = vadd.f32 %v973_v35, %v487_v34 }
  0xea   :  { %v975_v24 = vpop.f32.mrf.mxu1 }
  0xeb   :  { %v490_v40 = vadd.f32 %v954_v36, %v864_v32  ;;  %v976_v41 = vadd.f32 %v975_v24, %v974_v22 }
  0xec   :  { %v609_v26 = vpop.f32.mrf.mxu1 }
  0xed   :  { %v531_v47 = vadd.f32 %v976_v41, %v490_v40 }
  0xee   :  { %v1023_v27 = vpop.f32.mrf.mxu1 }
  0xf0   :  { %v612_v29 = vpop.f32.mrf.mxu1 }
  0xf2   :  { %v1024_v30 = vpop.f32.mrf.mxu1 }
 0x102   :  { %v993_v37 = vpop.f32.mrf.mxu0 }
 0x104   :  { %v994_v38 = vpop.f32.mrf.mxu0 }
 0x105   :  { %v995_v42 = vadd.f32 %v994_v38, %v993_v37 }
 0x106   :  { %v996_v44 = vpop.f32.mrf.mxu0 }
 0x107   :  { %v569_v45 = vadd.f32 %v995_v42, %v528_v39 }
 0x108   :  { %v997_v46 = vpop.f32.mrf.mxu0 }
 0x109   :  { %v998_v48 = vadd.f32 %v997_v46, %v996_v44  ;;  %v610_v49 = vadd.f32 %v609_v26, %v569_v45 }
 0x10b   :  { %v572_v50 = vadd.f32 %v998_v48, %v531_v47  ;;  %v616_v52 = vmax.f32 %v610_v49, 0.0 }
 0x10d   :  { %v613_v51 = vadd.f32 %v612_v29, %v572_v50 }
 0x10f   :  { %v617_v53 = vmax.f32 %v613_v51, 0.0 }
 0x111   :  { %v618_v54 = vpack.c.bf16 %v617_v53, %v616_v52 }
 0x113   :  { %1042 = vmatmul.mubr.bf16.vlgmr.msra.gmra.mxu1 %v618_v54 }
 0x1d3   :  { %v724_v59 = vpop.f32.mrf.mxu1 }
 0x1d4   :  { %v725_v61 = vadd.f32 %v915_v58, %v724_v59 }
 0x1d5   :  { %v1043_v60 = vpop.f32.mrf.mxu1 }
 0x1d6   :  { %v731_v1 = vmax.f32 %v725_v61, 0.0 }
 0x1d7   :  { %v727_v62 = vpop.f32.mrf.mxu1 }
 0x1d8   :  { %v728_v63 = vadd.f32 %v915_v58, %v727_v62 }
 0x1d9   :  { %v1044_v0 = vpop.f32.mrf.mxu1 }
 0x1da   :  { %v732_v2 = vmax.f32 %v728_v63, 0.0 }
 0x1dc   :  { %v733_v3 = vpack.c.bf16 %v732_v2, %v731_v1 }
 0x1de   :  { %1062 = vmatmul.mubr.bf16.vlgmr.msra.gmra.mxu0 %v733_v3 }
 0x29e   :  { %v839_v4 = vpop.f32.mrf.mxu0 }
 0x29f   :  { %v840_v5 = vadd.f32 %v924_v43, %v839_v4 }
 0x2a0   :  { %v1063_v6 = vpop.f32.mrf.mxu0 }
 0x2a1   :  { %846 = vst [vmem:[#allocation2] sm:$0xff] %v840_v5 }
 0x2a2   :  { %v842_v7 = vpop.f32.mrf.mxu0 }
 0x2a3   :  { %v843_v8 = vadd.f32 %v924_v43, %v842_v7 }
 0x2a4   :  { %v1064_v9 = vpop.f32.mrf.mxu0 }
 0x2a5   :  { %847 = vst [vmem:[#allocation2 + $0x8] sm:$0xff] %v843_v8 }
 0x2a6   :  { %1146 = shalt.err (!%p1143_p4)
}
 0x2a7   :  { %s1160_s22 = smov 128   ;;  %s1161_s6 = smov 8  }
 0x2a8   :  { %859 = dma.vmem_to_hbm [thread:$0]  %s854_s21, 256, %s1481_s7, [#allocation3], %s1160_s22, %s1160_s22, %s1161_s6  }
 0x2a9   :  { %1155 = dma.done.wait [#allocation3], 256  }
 0x2aa   :  { %1156 = vsyncadd [#allocation3], 4294967040 }
 0x2ab   :  { %863 = vsyncpa [#allocation3], 1 }

</bundles_post_ra>
